<compile_context>
chip_gen: v5e
topology: v5e:2x2
jax: 0.10.0
libtpu: 0.0.40
codegen_flags: <defaults>
</compile_context>

<pallas_src>
import jax
import jax.numpy as jnp
from jax import lax
from jax.experimental import pallas as pl
from jax.experimental.pallas import tpu as pltpu


# ---------------------------------------------------------------------------
# Pallas kernel: one grid step processes Tn time steps of the recurrence.
#   xw_ref  : (Tn, B, 4H)  precomputed input-gate contributions (incl. biases,
#                          g-columns pre-scaled by 2), time-major.
#   whh_ref : (H, 4H)      fused recurrent weight (g-columns pre-scaled by 2).
#   hh_ref  : (Tn, B, H)   per-step hidden states (time-major output block).
#   h_ref   : (B, H)       final hidden state; doubles as the carry (constant
#   c_ref   : (B, H)       index_map => resident in VMEM across the grid).
# ---------------------------------------------------------------------------
def _genlstm_kernel(xw_ref, whh_ref, hh_ref, h_ref, c_ref):
    Tn = xw_ref.shape[0]
    H = h_ref.shape[1]

    # Initialize the carries at the first grid step (forward() defaults).
    @pl.when(pl.program_id(0) == 0)
    def _():
        h_ref[...] = jnp.zeros_like(h_ref)
        c_ref[...] = jnp.zeros_like(c_ref)

    whh = whh_ref[...]          # hoisted, loop-invariant
    h0 = h_ref[...]
    c0 = c_ref[...]

    def step(t, carry):
        h, c = carry
        # Only matmul on the serial path: (B, H) @ (H, 4H).
        gates = xw_ref[t] + jnp.dot(h, whh, preferred_element_type=jnp.float32)

        # One sigmoid over all 4H = 128 lanes (gate order i | f | g | o; the
        # g columns arrive pre-scaled by 2 so tanh(x) = 2*sigmoid(2x) - 1).
        s = jax.nn.sigmoid(gates)
        i_g = s[:, 0 * H:1 * H]
        f_g = s[:, 1 * H:2 * H]
        g_g = 2.0 * s[:, 2 * H:3 * H] - 1.0
        o_g = s[:, 3 * H:4 * H]

        c = f_g * c + i_g * g_g
        h = o_g * jnp.tanh(c)

        hh_ref[t] = h           # output projection happens outside the loop
        return (h, c)

    h, c = lax.fori_loop(0, Tn, step, (h0, c0), unroll=min(Tn, 8))

    h_ref[...] = h
    c_ref[...] = c


def _pick_block_steps(n):
    """Largest time block (<=256) that divides n; else the whole sequence."""
    for cand in (256, 128, 64, 32, 16, 8):
        if n % cand == 0:
            return cand
    return n


# ---------------------------------------------------------------------------
# Wrapper: weight fusion, bias folding, hoisted input/output projections.
# ---------------------------------------------------------------------------
def genlstm_forward(noise, dts, params, *, hidden_size, seq_dim, noise_dim,
                    block_steps=None):
    """noise: (B, n, noise_dim) f32; dts: (B, n, 1) f32.

    Returns (output_seq (B,n,seq_dim), h (1,B,H), c (1,B,H)) — same as the
    PyTorch module with hist_x=None, h=c=last_return=None.
    """
    B, n, _ = noise.shape
    H = hidden_size
    G = 4 * H

    W_ih, W_hh, b_ih, b_hh, W_out, b_out = (
        params["W_ih"], params["W_hh"], params["b_ih"],
        params["b_hh"], params["W_out"], params["b_out"])

    # Input concat order is [last_return | noise | dt].
    wx = jnp.transpose(W_ih[:, :seq_dim]).astype(jnp.float32)        # (seq_dim, 4H)
    wnd = jnp.transpose(W_ih[:, seq_dim:]).astype(jnp.float32)       # (nd+1, 4H)
    whh = jnp.transpose(W_hh).astype(jnp.float32)                    # (H, 4H)
    wout = jnp.transpose(W_out).astype(jnp.float32)                  # (H, seq_dim)
    bout = b_out.astype(jnp.float32)                                 # (seq_dim,)
    b0 = (b_ih + b_hh).astype(jnp.float32)                           # (4H,)

    # Fold last_return = h @ wout + bout into the recurrent weight / bias.
    whh_eff = whh + wout @ wx                                        # (H, 4H)
    b_eff = b0 + bout @ wx                                           # (4H,)

    # g-gate columns (PyTorch order i,f,g,o -> slice [2H:3H]) pre-scaled by 2
    # so one sigmoid over all 4H lanes also yields tanh via 2*sig(2x)-1.
    scale = jnp.concatenate([jnp.ones((2 * H,), jnp.float32),
                             2.0 * jnp.ones((H,), jnp.float32),
                             jnp.ones((H,), jnp.float32)])
    whh_s = (whh_eff * scale[None, :]).astype(jnp.float32)

    # Hoisted input projection + bias folding (plain XLA, off the serial path).
    inp = jnp.concatenate([noise, dts], axis=-1).astype(jnp.float32)  # (B, n, nd+1)
    xw = jnp.einsum("bnf,fg->bng", inp, wnd) + b_eff[None, None, :]
    # Global step 0 uses the un-fused bias (last_return is exactly zero there).
    xw = xw.at[:, 0, :].add(b0 - b_eff)
    xw = (xw * scale[None, None, :]).astype(jnp.float32)
    xw_t = jnp.transpose(xw, (1, 0, 2))                               # (n, B, 4H)

    Tn = block_steps if block_steps is not None else _pick_block_steps(n)
    assert n % Tn == 0, "time block must divide the sequence length"
    grid = (n // Tn,)

    hh, h_out, c_out = pl.pallas_call(
        _genlstm_kernel,
        grid=grid,
        out_shape=(
            jax.ShapeDtypeStruct((n, B, H), jnp.float32),
            jax.ShapeDtypeStruct((B, H), jnp.float32),
            jax.ShapeDtypeStruct((B, H), jnp.float32),
        ),
        in_specs=[
            pl.BlockSpec((Tn, B, G), lambda i: (i, 0, 0)),   # xw (time-blocked)
            pl.BlockSpec((H, G), lambda i: (0, 0)),          # whh_eff (resident)
        ],
        out_specs=(
            pl.BlockSpec((Tn, B, H), lambda i: (i, 0, 0)),   # per-step h
            pl.BlockSpec((B, H), lambda i: (0, 0)),          # final h (carry)
            pl.BlockSpec((B, H), lambda i: (0, 0)),          # final c (carry)
        ),
        compiler_params=pltpu.CompilerParams(
            dimension_semantics=("arbitrary",)),
    )(xw_t, whh_s)

    # Batched output projection (one matmul for all steps, off the serial path).
    output_seq = jnp.einsum("nbh,hs->bns", hh, wout) + bout[None, None, :]
    return output_seq, h_out[None, ...], c_out[None, ...]


# ---------------------------------------------------------------------------
# Pure-JAX reference (mirrors the PyTorch loop) for a correctness check.
# ---------------------------------------------------------------------------
def genlstm_reference(noise, dts, params, *, hidden_size, seq_dim):
    B, n, _ = noise.shape
    H = hidden_size
    W_ih, W_hh, b_ih, b_hh, W_out, b_out = (
        params["W_ih"], params["W_hh"], params["b_ih"],
        params["b_hh"], params["W_out"], params["b_out"])

    def step(carry, xs):
        h, c, lr = carry
        noise_t, dt_t = xs
        x = jnp.concatenate([lr, noise_t, dt_t], axis=-1)          # (B, D_in)
        gates = x @ W_ih.T + b_ih + h @ W_hh.T + b_hh              # (B, 4H)
        i_g = jax.nn.sigmoid(gates[:, 0 * H:1 * H])
        f_g = jax.nn.sigmoid(gates[:, 1 * H:2 * H])
        g_g = jnp.tanh(gates[:, 2 * H:3 * H])
        o_g = jax.nn.sigmoid(gates[:, 3 * H:4 * H])
        c_new = f_g * c + i_g * g_g
        h_new = o_g * jnp.tanh(c_new)
        lr_new = h_new @ W_out.T + b_out
        return (h_new, c_new, lr_new), lr_new

    init = (jnp.zeros((B, H)), jnp.zeros((B, H)), jnp.zeros((B, seq_dim)))
    xs = (jnp.transpose(noise, (1, 0, 2)), jnp.transpose(dts, (1, 0, 2)))
    (h, c, _), outs = lax.scan(step, init, xs)
    return jnp.transpose(outs, (1, 0, 2)), h[None], c[None]


if __name__ == "__main__":
    batch = 2
    seq_dim = 4        # number of "stocks"
    noise_dim = 4
    hidden_size = 32   # 4H = 128 -> one lane-exact gate vreg
    D_in = seq_dim + noise_dim + 1

    key = jax.random.PRNGKey(0)
    k_wih, k_whh, k_bih, k_bhh, k_wo, k_bo = jax.random.split(key, 6)

    bound = 1.0 / jnp.sqrt(hidden_size)   # PyTorch default LSTM/Linear init range
    params = {
        "W_ih": jax.random.uniform(k_wih, (4 * hidden_size, D_in), jnp.float32, -bound, bound),
        "W_hh": jax.random.uniform(k_whh, (4 * hidden_size, hidden_size), jnp.float32, -bound, bound),
        "b_ih": jax.random.uniform(k_bih, (4 * hidden_size,), jnp.float32, -bound, bound),
        "b_hh": jax.random.uniform(k_bhh, (4 * hidden_size,), jnp.float32, -bound, bound),
        "W_out": jax.random.uniform(k_wo, (seq_dim, hidden_size), jnp.float32, -bound, bound),
        "b_out": jax.random.uniform(k_bo, (seq_dim,), jnp.float32, -bound, bound),
    }

    def run_case(n_steps, block_steps=None):
        kn, kd = jax.random.split(jax.random.fold_in(key, n_steps))
        noise = jax.random.normal(kn, (batch, n_steps, noise_dim), jnp.float32)
        dts = jnp.abs(jax.random.normal(kd, (batch, n_steps, 1), jnp.float32)) * 0.1

        out_seq, h, c = genlstm_forward(noise, dts, params,
                                        hidden_size=hidden_size,
                                        seq_dim=seq_dim, noise_dim=noise_dim,
                                        block_steps=block_steps)
        jax.block_until_ready((out_seq, h, c))

        ref_seq, ref_h, ref_c = genlstm_reference(noise, dts, params,
                                                  hidden_size=hidden_size,
                                                  seq_dim=seq_dim)
        assert out_seq.shape == (batch, n_steps, seq_dim)
        assert h.shape == (1, batch, hidden_size) and c.shape == (1, batch, hidden_size)
        assert jnp.allclose(out_seq, ref_seq, atol=1e-3, rtol=1e-3)
        assert jnp.allclose(h, ref_h, atol=1e-3, rtol=1e-3)
        assert jnp.allclose(c, ref_c, atol=1e-3, rtol=1e-3)

    run_case(8)                     # single time block (grid = 1)
    run_case(16, block_steps=8)     # multi-block: carry + step-0 bias fixup path
    run_case(256)                   # larger block (Tn=256), fori_loop unroll=8

    print("KERNEL_OK")
</pallas_src>

<mosaic_0001>
module attributes {stable_mosaic.version = 11 : i64} {
  func.func @_genlstm_kernel(%arg0: i32, %arg1: memref<8x2x128xf32, #tpu.memory_space<vmem>>, %arg2: memref<32x128xf32, #tpu.memory_space<vmem>>, %arg3: memref<8x2x32xf32, #tpu.memory_space<vmem>>, %arg4: memref<2x32xf32, #tpu.memory_space<vmem>>, %arg5: memref<2x32xf32, #tpu.memory_space<vmem>>) attributes {dimension_semantics = [#tpu.dimension_semantics<arbitrary>], iteration_bounds = array<i64: 1>, scalar_prefetch = 0 : i64, scratch_operands = 0 : i64, tpu.core_type = #tpu.core_type<tc>, window_params = [{transform_indices = @transform_0, window_bounds = array<i64: 8, 2, 128>}, {pipeline_mode = #tpu.pipeline_mode<synchronous>, transform_indices = @transform_1, window_bounds = array<i64: 32, 128>}, {transform_indices = @transform_2, window_bounds = array<i64: 8, 2, 32>}, {pipeline_mode = #tpu.pipeline_mode<synchronous>, transform_indices = @transform_3, window_bounds = array<i64: 2, 32>}, {pipeline_mode = #tpu.pipeline_mode<synchronous>, transform_indices = @transform_4, window_bounds = array<i64: 2, 32>}]} {
    %c0_i32 = arith.constant 0 : i32
    %0 = arith.cmpi eq, %arg0, %c0_i32 : i32
    %1 = arith.extui %0 : i1 to i32
    %c0_i32_0 = arith.constant 0 : i32
    %2 = arith.cmpi ne, %1, %c0_i32_0 : i32
    scf.if %2 {
      %cst_74 = arith.constant 0.000000e+00 : f32
      %224 = vector.broadcast %cst_74 : f32 to vector<2x32xf32>
      %c0_75 = arith.constant 0 : index
      %c0_76 = arith.constant 0 : index
      %225 = vector.load %arg4[%c0_75, %c0_76] : memref<2x32xf32, #tpu.memory_space<vmem>>, vector<2x32xf32>
      tpu.vector_store %arg4[%c0_75, %c0_76], %224 {strides = array<i32>} : memref<2x32xf32, #tpu.memory_space<vmem>>, vector<2x32xf32>,
      %cst_77 = arith.constant 0.000000e+00 : f32
      %226 = vector.broadcast %cst_77 : f32 to vector<2x32xf32>
      %c0_78 = arith.constant 0 : index
      %c0_79 = arith.constant 0 : index
      %227 = vector.load %arg5[%c0_78, %c0_79] : memref<2x32xf32, #tpu.memory_space<vmem>>, vector<2x32xf32>
      tpu.vector_store %arg5[%c0_78, %c0_79], %226 {strides = array<i32>} : memref<2x32xf32, #tpu.memory_space<vmem>>, vector<2x32xf32>,
    } else {
    }
    %c0 = arith.constant 0 : index
    %c0_1 = arith.constant 0 : index
    %3 = vector.load %arg2[%c0, %c0_1] : memref<32x128xf32, #tpu.memory_space<vmem>>, vector<32x128xf32>
    %c0_2 = arith.constant 0 : index
    %c0_3 = arith.constant 0 : index
    %4 = vector.load %arg4[%c0_2, %c0_3] : memref<2x32xf32, #tpu.memory_space<vmem>>, vector<2x32xf32>
    %c0_4 = arith.constant 0 : index
    %c0_5 = arith.constant 0 : index
    %5 = vector.load %arg5[%c0_4, %c0_5] : memref<2x32xf32, #tpu.memory_space<vmem>>, vector<2x32xf32>
    %c0_i32_6 = arith.constant 0 : i32
    %6 = arith.index_cast %c0_i32_6 : i32 to index
    %c0_7 = arith.constant 0 : index
    %c0_8 = arith.constant 0 : index
    %7 = vector.load %arg1[%6, %c0_7, %c0_8] : memref<8x2x128xf32, #tpu.memory_space<vmem>>, vector<1x2x128xf32>
    %8 = vector.shape_cast %7 : vector<1x2x128xf32> to vector<2x128xf32>
    %cst = arith.constant dense<0.000000e+00> : vector<2x128xf32>
    %9 = tpu.matmul %4, %3, %cst {dimension_numbers = #tpu.dot_dimension_numbers<[1], [0], [0], [1], [0, 0, 1, 1], [], []>} : vector<2x32xf32>, vector<32x128xf32>, vector<2x128xf32> -> vector<2x128xf32>
    %10 = arith.addf %8, %9 : vector<2x128xf32>
    %11 = arith.negf %10 : vector<2x128xf32>
    %12 = math.exp %11 : vector<2x128xf32>
    %cst_9 = arith.constant 1.000000e+00 : f32
    %13 = vector.broadcast %cst_9 : f32 to vector<2x128xf32>
    %14 = arith.addf %13, %12 : vector<2x128xf32>
    %15 = arith.divf %13, %14 : vector<2x128xf32>
    %16 = vector.extract_strided_slice %15 {offsets = [0, 0], sizes = [2, 32], strides = [1, 1]} : vector<2x128xf32> to vector<2x32xf32>
    %17 = vector.extract_strided_slice %15 {offsets = [0, 32], sizes = [2, 32], strides = [1, 1]} : vector<2x128xf32> to vector<2x32xf32>
    %18 = vector.extract_strided_slice %15 {offsets = [0, 64], sizes = [2, 32], strides = [1, 1]} : vector<2x128xf32> to vector<2x32xf32>
    %cst_10 = arith.constant 2.000000e+00 : f32
    %19 = vector.broadcast %cst_10 : f32 to vector<2x32xf32>
    %20 = arith.mulf %19, %18 : vector<2x32xf32>
    %cst_11 = arith.constant 1.000000e+00 : f32
    %21 = vector.broadcast %cst_11 : f32 to vector<2x32xf32>
    %22 = arith.subf %20, %21 : vector<2x32xf32>
    %23 = vector.extract_strided_slice %15 {offsets = [0, 96], sizes = [2, 32], strides = [1, 1]} : vector<2x128xf32> to vector<2x32xf32>
    %24 = arith.mulf %17, %5 : vector<2x32xf32>
    %25 = arith.mulf %16, %22 : vector<2x32xf32>
    %26 = arith.addf %24, %25 : vector<2x32xf32>
    %27 = math.tanh %26 : vector<2x32xf32>
    %28 = arith.mulf %23, %27 : vector<2x32xf32>
    %29 = arith.index_cast %c0_i32_6 : i32 to index
    %c0_12 = arith.constant 0 : index
    %c0_13 = arith.constant 0 : index
    %30 = vector.load %arg3[%29, %c0_12, %c0_13] : memref<8x2x32xf32, #tpu.memory_space<vmem>>, vector<1x2x32xf32>
    %31 = vector.shape_cast %30 : vector<1x2x32xf32> to vector<2x32xf32>
    %32 = vector.shape_cast %28 : vector<2x32xf32> to vector<1x2x32xf32>
    tpu.vector_store %arg3[%29, %c0_12, %c0_13], %32 {strides = array<i32>} : memref<8x2x32xf32, #tpu.memory_space<vmem>>, vector<1x2x32xf32>,
    %c1_i32 = arith.constant 1 : i32
    %33 = arith.index_cast %c1_i32 : i32 to index
    %c0_14 = arith.constant 0 : index
    %c0_15 = arith.constant 0 : index
    %34 = vector.load %arg1[%33, %c0_14, %c0_15] : memref<8x2x128xf32, #tpu.memory_space<vmem>>, vector<1x2x128xf32>
    %35 = vector.shape_cast %34 : vector<1x2x128xf32> to vector<2x128xf32>
    %cst_16 = arith.constant dense<0.000000e+00> : vector<2x128xf32>
    %36 = tpu.matmul %28, %3, %cst_16 {dimension_numbers = #tpu.dot_dimension_numbers<[1], [0], [0], [1], [0, 0, 1, 1], [], []>} : vector<2x32xf32>, vector<32x128xf32>, vector<2x128xf32> -> vector<2x128xf32>
    %37 = arith.addf %35, %36 : vector<2x128xf32>
    %38 = arith.negf %37 : vector<2x128xf32>
    %39 = math.exp %38 : vector<2x128xf32>
    %cst_17 = arith.constant 1.000000e+00 : f32
    %40 = vector.broadcast %cst_17 : f32 to vector<2x128xf32>
    %41 = arith.addf %40, %39 : vector<2x128xf32>
    %42 = arith.divf %40, %41 : vector<2x128xf32>
    %43 = vector.extract_strided_slice %42 {offsets = [0, 0], sizes = [2, 32], strides = [1, 1]} : vector<2x128xf32> to vector<2x32xf32>
    %44 = vector.extract_strided_slice %42 {offsets = [0, 32], sizes = [2, 32], strides = [1, 1]} : vector<2x128xf32> to vector<2x32xf32>
    %45 = vector.extract_strided_slice %42 {offsets = [0, 64], sizes = [2, 32], strides = [1, 1]} : vector<2x128xf32> to vector<2x32xf32>
    %cst_18 = arith.constant 2.000000e+00 : f32
    %46 = vector.broadcast %cst_18 : f32 to vector<2x32xf32>
    %47 = arith.mulf %46, %45 : vector<2x32xf32>
    %cst_19 = arith.constant 1.000000e+00 : f32
    %48 = vector.broadcast %cst_19 : f32 to vector<2x32xf32>
    %49 = arith.subf %47, %48 : vector<2x32xf32>
    %50 = vector.extract_strided_slice %42 {offsets = [0, 96], sizes = [2, 32], strides = [1, 1]} : vector<2x128xf32> to vector<2x32xf32>
    %51 = arith.mulf %44, %26 : vector<2x32xf32>
    %52 = arith.mulf %43, %49 : vector<2x32xf32>
    %53 = arith.addf %51, %52 : vector<2x32xf32>
    %54 = math.tanh %53 : vector<2x32xf32>
    %55 = arith.mulf %50, %54 : vector<2x32xf32>
    %56 = arith.index_cast %c1_i32 : i32 to index
    %c0_20 = arith.constant 0 : index
    %c0_21 = arith.constant 0 : index
    %57 = vector.load %arg3[%56, %c0_20, %c0_21] : memref<8x2x32xf32, #tpu.memory_space<vmem>>, vector<1x2x32xf32>
    %58 = vector.shape_cast %57 : vector<1x2x32xf32> to vector<2x32xf32>
    %59 = vector.shape_cast %55 : vector<2x32xf32> to vector<1x2x32xf32>
    tpu.vector_store %arg3[%56, %c0_20, %c0_21], %59 {strides = array<i32>} : memref<8x2x32xf32, #tpu.memory_space<vmem>>, vector<1x2x32xf32>,
    %c2_i32 = arith.constant 2 : i32
    %60 = arith.index_cast %c2_i32 : i32 to index
    %c0_22 = arith.constant 0 : index
    %c0_23 = arith.constant 0 : index
    %61 = vector.load %arg1[%60, %c0_22, %c0_23] : memref<8x2x128xf32, #tpu.memory_space<vmem>>, vector<1x2x128xf32>
    %62 = vector.shape_cast %61 : vector<1x2x128xf32> to vector<2x128xf32>
    %cst_24 = arith.constant dense<0.000000e+00> : vector<2x128xf32>
    %63 = tpu.matmul %55, %3, %cst_24 {dimension_numbers = #tpu.dot_dimension_numbers<[1], [0], [0], [1], [0, 0, 1, 1], [], []>} : vector<2x32xf32>, vector<32x128xf32>, vector<2x128xf32> -> vector<2x128xf32>
    %64 = arith.addf %62, %63 : vector<2x128xf32>
    %65 = arith.negf %64 : vector<2x128xf32>
    %66 = math.exp %65 : vector<2x128xf32>
    %cst_25 = arith.constant 1.000000e+00 : f32
    %67 = vector.broadcast %cst_25 : f32 to vector<2x128xf32>
    %68 = arith.addf %67, %66 : vector<2x128xf32>
    %69 = arith.divf %67, %68 : vector<2x128xf32>
    %70 = vector.extract_strided_slice %69 {offsets = [0, 0], sizes = [2, 32], strides = [1, 1]} : vector<2x128xf32> to vector<2x32xf32>
    %71 = vector.extract_strided_slice %69 {offsets = [0, 32], sizes = [2, 32], strides = [1, 1]} : vector<2x128xf32> to vector<2x32xf32>
    %72 = vector.extract_strided_slice %69 {offsets = [0, 64], sizes = [2, 32], strides = [1, 1]} : vector<2x128xf32> to vector<2x32xf32>
    %cst_26 = arith.constant 2.000000e+00 : f32
    %73 = vector.broadcast %cst_26 : f32 to vector<2x32xf32>
    %74 = arith.mulf %73, %72 : vector<2x32xf32>
    %cst_27 = arith.constant 1.000000e+00 : f32
    %75 = vector.broadcast %cst_27 : f32 to vector<2x32xf32>
    %76 = arith.subf %74, %75 : vector<2x32xf32>
    %77 = vector.extract_strided_slice %69 {offsets = [0, 96], sizes = [2, 32], strides = [1, 1]} : vector<2x128xf32> to vector<2x32xf32>
    %78 = arith.mulf %71, %53 : vector<2x32xf32>
    %79 = arith.mulf %70, %76 : vector<2x32xf32>
    %80 = arith.addf %78, %79 : vector<2x32xf32>
    %81 = math.tanh %80 : vector<2x32xf32>
    %82 = arith.mulf %77, %81 : vector<2x32xf32>
    %83 = arith.index_cast %c2_i32 : i32 to index
    %c0_28 = arith.constant 0 : index
    %c0_29 = arith.constant 0 : index
    %84 = vector.load %arg3[%83, %c0_28, %c0_29] : memref<8x2x32xf32, #tpu.memory_space<vmem>>, vector<1x2x32xf32>
    %85 = vector.shape_cast %84 : vector<1x2x32xf32> to vector<2x32xf32>
    %86 = vector.shape_cast %82 : vector<2x32xf32> to vector<1x2x32xf32>
    tpu.vector_store %arg3[%83, %c0_28, %c0_29], %86 {strides = array<i32>} : memref<8x2x32xf32, #tpu.memory_space<vmem>>, vector<1x2x32xf32>,
    %c3_i32 = arith.constant 3 : i32
    %87 = arith.index_cast %c3_i32 : i32 to index
    %c0_30 = arith.constant 0 : index
    %c0_31 = arith.constant 0 : index
    %88 = vector.load %arg1[%87, %c0_30, %c0_31] : memref<8x2x128xf32, #tpu.memory_space<vmem>>, vector<1x2x128xf32>
    %89 = vector.shape_cast %88 : vector<1x2x128xf32> to vector<2x128xf32>
    %cst_32 = arith.constant dense<0.000000e+00> : vector<2x128xf32>
    %90 = tpu.matmul %82, %3, %cst_32 {dimension_numbers = #tpu.dot_dimension_numbers<[1], [0], [0], [1], [0, 0, 1, 1], [], []>} : vector<2x32xf32>, vector<32x128xf32>, vector<2x128xf32> -> vector<2x128xf32>
    %91 = arith.addf %89, %90 : vector<2x128xf32>
    %92 = arith.negf %91 : vector<2x128xf32>
    %93 = math.exp %92 : vector<2x128xf32>
    %cst_33 = arith.constant 1.000000e+00 : f32
    %94 = vector.broadcast %cst_33 : f32 to vector<2x128xf32>
    %95 = arith.addf %94, %93 : vector<2x128xf32>
    %96 = arith.divf %94, %95 : vector<2x128xf32>
    %97 = vector.extract_strided_slice %96 {offsets = [0, 0], sizes = [2, 32], strides = [1, 1]} : vector<2x128xf32> to vector<2x32xf32>
    %98 = vector.extract_strided_slice %96 {offsets = [0, 32], sizes = [2, 32], strides = [1, 1]} : vector<2x128xf32> to vector<2x32xf32>
    %99 = vector.extract_strided_slice %96 {offsets = [0, 64], sizes = [2, 32], strides = [1, 1]} : vector<2x128xf32> to vector<2x32xf32>
    %cst_34 = arith.constant 2.000000e+00 : f32
    %100 = vector.broadcast %cst_34 : f32 to vector<2x32xf32>
    %101 = arith.mulf %100, %99 : vector<2x32xf32>
    %cst_35 = arith.constant 1.000000e+00 : f32
    %102 = vector.broadcast %cst_35 : f32 to vector<2x32xf32>
    %103 = arith.subf %101, %102 : vector<2x32xf32>
    %104 = vector.extract_strided_slice %96 {offsets = [0, 96], sizes = [2, 32], strides = [1, 1]} : vector<2x128xf32> to vector<2x32xf32>
    %105 = arith.mulf %98, %80 : vector<2x32xf32>
    %106 = arith.mulf %97, %103 : vector<2x32xf32>
    %107 = arith.addf %105, %106 : vector<2x32xf32>
    %108 = math.tanh %107 : vector<2x32xf32>
    %109 = arith.mulf %104, %108 : vector<2x32xf32>
    %110 = arith.index_cast %c3_i32 : i32 to index
    %c0_36 = arith.constant 0 : index
    %c0_37 = arith.constant 0 : index
    %111 = vector.load %arg3[%110, %c0_36, %c0_37] : memref<8x2x32xf32, #tpu.memory_space<vmem>>, vector<1x2x32xf32>
    %112 = vector.shape_cast %111 : vector<1x2x32xf32> to vector<2x32xf32>
    %113 = vector.shape_cast %109 : vector<2x32xf32> to vector<1x2x32xf32>
    tpu.vector_store %arg3[%110, %c0_36, %c0_37], %113 {strides = array<i32>} : memref<8x2x32xf32, #tpu.memory_space<vmem>>, vector<1x2x32xf32>,
    %c4_i32 = arith.constant 4 : i32
    %114 = arith.index_cast %c4_i32 : i32 to index
    %c0_38 = arith.constant 0 : index
    %c0_39 = arith.constant 0 : index
    %115 = vector.load %arg1[%114, %c0_38, %c0_39] : memref<8x2x128xf32, #tpu.memory_space<vmem>>, vector<1x2x128xf32>
    %116 = vector.shape_cast %115 : vector<1x2x128xf32> to vector<2x128xf32>
    %cst_40 = arith.constant dense<0.000000e+00> : vector<2x128xf32>
    %117 = tpu.matmul %109, %3, %cst_40 {dimension_numbers = #tpu.dot_dimension_numbers<[1], [0], [0], [1], [0, 0, 1, 1], [], []>} : vector<2x32xf32>, vector<32x128xf32>, vector<2x128xf32> -> vector<2x128xf32>
    %118 = arith.addf %116, %117 : vector<2x128xf32>
    %119 = arith.negf %118 : vector<2x128xf32>
    %120 = math.exp %119 : vector<2x128xf32>
    %cst_41 = arith.constant 1.000000e+00 : f32
    %121 = vector.broadcast %cst_41 : f32 to vector<2x128xf32>
    %122 = arith.addf %121, %120 : vector<2x128xf32>
    %123 = arith.divf %121, %122 : vector<2x128xf32>
    %124 = vector.extract_strided_slice %123 {offsets = [0, 0], sizes = [2, 32], strides = [1, 1]} : vector<2x128xf32> to vector<2x32xf32>
    %125 = vector.extract_strided_slice %123 {offsets = [0, 32], sizes = [2, 32], strides = [1, 1]} : vector<2x128xf32> to vector<2x32xf32>
    %126 = vector.extract_strided_slice %123 {offsets = [0, 64], sizes = [2, 32], strides = [1, 1]} : vector<2x128xf32> to vector<2x32xf32>
    %cst_42 = arith.constant 2.000000e+00 : f32
    %127 = vector.broadcast %cst_42 : f32 to vector<2x32xf32>
    %128 = arith.mulf %127, %126 : vector<2x32xf32>
    %cst_43 = arith.constant 1.000000e+00 : f32
    %129 = vector.broadcast %cst_43 : f32 to vector<2x32xf32>
    %130 = arith.subf %128, %129 : vector<2x32xf32>
    %131 = vector.extract_strided_slice %123 {offsets = [0, 96], sizes = [2, 32], strides = [1, 1]} : vector<2x128xf32> to vector<2x32xf32>
    %132 = arith.mulf %125, %107 : vector<2x32xf32>
    %133 = arith.mulf %124, %130 : vector<2x32xf32>
    %134 = arith.addf %132, %133 : vector<2x32xf32>
    %135 = math.tanh %134 : vector<2x32xf32>
    %136 = arith.mulf %131, %135 : vector<2x32xf32>
    %137 = arith.index_cast %c4_i32 : i32 to index
    %c0_44 = arith.constant 0 : index
    %c0_45 = arith.constant 0 : index
    %138 = vector.load %arg3[%137, %c0_44, %c0_45] : memref<8x2x32xf32, #tpu.memory_space<vmem>>, vector<1x2x32xf32>
    %139 = vector.shape_cast %138 : vector<1x2x32xf32> to vector<2x32xf32>
    %140 = vector.shape_cast %136 : vector<2x32xf32> to vector<1x2x32xf32>
    tpu.vector_store %arg3[%137, %c0_44, %c0_45], %140 {strides = array<i32>} : memref<8x2x32xf32, #tpu.memory_space<vmem>>, vector<1x2x32xf32>,
    %c5_i32 = arith.constant 5 : i32
    %141 = arith.index_cast %c5_i32 : i32 to index
    %c0_46 = arith.constant 0 : index
    %c0_47 = arith.constant 0 : index
    %142 = vector.load %arg1[%141, %c0_46, %c0_47] : memref<8x2x128xf32, #tpu.memory_space<vmem>>, vector<1x2x128xf32>
    %143 = vector.shape_cast %142 : vector<1x2x128xf32> to vector<2x128xf32>
    %cst_48 = arith.constant dense<0.000000e+00> : vector<2x128xf32>
    %144 = tpu.matmul %136, %3, %cst_48 {dimension_numbers = #tpu.dot_dimension_numbers<[1], [0], [0], [1], [0, 0, 1, 1], [], []>} : vector<2x32xf32>, vector<32x128xf32>, vector<2x128xf32> -> vector<2x128xf32>
    %145 = arith.addf %143, %144 : vector<2x128xf32>
    %146 = arith.negf %145 : vector<2x128xf32>
    %147 = math.exp %146 : vector<2x128xf32>
    %cst_49 = arith.constant 1.000000e+00 : f32
    %148 = vector.broadcast %cst_49 : f32 to vector<2x128xf32>
    %149 = arith.addf %148, %147 : vector<2x128xf32>
    %150 = arith.divf %148, %149 : vector<2x128xf32>
    %151 = vector.extract_strided_slice %150 {offsets = [0, 0], sizes = [2, 32], strides = [1, 1]} : vector<2x128xf32> to vector<2x32xf32>
    %152 = vector.extract_strided_slice %150 {offsets = [0, 32], sizes = [2, 32], strides = [1, 1]} : vector<2x128xf32> to vector<2x32xf32>
    %153 = vector.extract_strided_slice %150 {offsets = [0, 64], sizes = [2, 32], strides = [1, 1]} : vector<2x128xf32> to vector<2x32xf32>
    %cst_50 = arith.constant 2.000000e+00 : f32
    %154 = vector.broadcast %cst_50 : f32 to vector<2x32xf32>
    %155 = arith.mulf %154, %153 : vector<2x32xf32>
    %cst_51 = arith.constant 1.000000e+00 : f32
    %156 = vector.broadcast %cst_51 : f32 to vector<2x32xf32>
    %157 = arith.subf %155, %156 : vector<2x32xf32>
    %158 = vector.extract_strided_slice %150 {offsets = [0, 96], sizes = [2, 32], strides = [1, 1]} : vector<2x128xf32> to vector<2x32xf32>
    %159 = arith.mulf %152, %134 : vector<2x32xf32>
    %160 = arith.mulf %151, %157 : vector<2x32xf32>
    %161 = arith.addf %159, %160 : vector<2x32xf32>
    %162 = math.tanh %161 : vector<2x32xf32>
    %163 = arith.mulf %158, %162 : vector<2x32xf32>
    %164 = arith.index_cast %c5_i32 : i32 to index
    %c0_52 = arith.constant 0 : index
    %c0_53 = arith.constant 0 : index
    %165 = vector.load %arg3[%164, %c0_52, %c0_53] : memref<8x2x32xf32, #tpu.memory_space<vmem>>, vector<1x2x32xf32>
    %166 = vector.shape_cast %165 : vector<1x2x32xf32> to vector<2x32xf32>
    %167 = vector.shape_cast %163 : vector<2x32xf32> to vector<1x2x32xf32>
    tpu.vector_store %arg3[%164, %c0_52, %c0_53], %167 {strides = array<i32>} : memref<8x2x32xf32, #tpu.memory_space<vmem>>, vector<1x2x32xf32>,
    %c6_i32 = arith.constant 6 : i32
    %168 = arith.index_cast %c6_i32 : i32 to index
    %c0_54 = arith.constant 0 : index
    %c0_55 = arith.constant 0 : index
    %169 = vector.load %arg1[%168, %c0_54, %c0_55] : memref<8x2x128xf32, #tpu.memory_space<vmem>>, vector<1x2x128xf32>
    %170 = vector.shape_cast %169 : vector<1x2x128xf32> to vector<2x128xf32>
    %cst_56 = arith.constant dense<0.000000e+00> : vector<2x128xf32>
    %171 = tpu.matmul %163, %3, %cst_56 {dimension_numbers = #tpu.dot_dimension_numbers<[1], [0], [0], [1], [0, 0, 1, 1], [], []>} : vector<2x32xf32>, vector<32x128xf32>, vector<2x128xf32> -> vector<2x128xf32>
    %172 = arith.addf %170, %171 : vector<2x128xf32>
    %173 = arith.negf %172 : vector<2x128xf32>
    %174 = math.exp %173 : vector<2x128xf32>
    %cst_57 = arith.constant 1.000000e+00 : f32
    %175 = vector.broadcast %cst_57 : f32 to vector<2x128xf32>
    %176 = arith.addf %175, %174 : vector<2x128xf32>
    %177 = arith.divf %175, %176 : vector<2x128xf32>
    %178 = vector.extract_strided_slice %177 {offsets = [0, 0], sizes = [2, 32], strides = [1, 1]} : vector<2x128xf32> to vector<2x32xf32>
    %179 = vector.extract_strided_slice %177 {offsets = [0, 32], sizes = [2, 32], strides = [1, 1]} : vector<2x128xf32> to vector<2x32xf32>
    %180 = vector.extract_strided_slice %177 {offsets = [0, 64], sizes = [2, 32], strides = [1, 1]} : vector<2x128xf32> to vector<2x32xf32>
    %cst_58 = arith.constant 2.000000e+00 : f32
    %181 = vector.broadcast %cst_58 : f32 to vector<2x32xf32>
    %182 = arith.mulf %181, %180 : vector<2x32xf32>
    %cst_59 = arith.constant 1.000000e+00 : f32
    %183 = vector.broadcast %cst_59 : f32 to vector<2x32xf32>
    %184 = arith.subf %182, %183 : vector<2x32xf32>
    %185 = vector.extract_strided_slice %177 {offsets = [0, 96], sizes = [2, 32], strides = [1, 1]} : vector<2x128xf32> to vector<2x32xf32>
    %186 = arith.mulf %179, %161 : vector<2x32xf32>
    %187 = arith.mulf %178, %184 : vector<2x32xf32>
    %188 = arith.addf %186, %187 : vector<2x32xf32>
    %189 = math.tanh %188 : vector<2x32xf32>
    %190 = arith.mulf %185, %189 : vector<2x32xf32>
    %191 = arith.index_cast %c6_i32 : i32 to index
    %c0_60 = arith.constant 0 : index
    %c0_61 = arith.constant 0 : index
    %192 = vector.load %arg3[%191, %c0_60, %c0_61] : memref<8x2x32xf32, #tpu.memory_space<vmem>>, vector<1x2x32xf32>
    %193 = vector.shape_cast %192 : vector<1x2x32xf32> to vector<2x32xf32>
    %194 = vector.shape_cast %190 : vector<2x32xf32> to vector<1x2x32xf32>
    tpu.vector_store %arg3[%191, %c0_60, %c0_61], %194 {strides = array<i32>} : memref<8x2x32xf32, #tpu.memory_space<vmem>>, vector<1x2x32xf32>,
    %c7_i32 = arith.constant 7 : i32
    %195 = arith.index_cast %c7_i32 : i32 to index
    %c0_62 = arith.constant 0 : index
    %c0_63 = arith.constant 0 : index
    %196 = vector.load %arg1[%195, %c0_62, %c0_63] : memref<8x2x128xf32, #tpu.memory_space<vmem>>, vector<1x2x128xf32>
    %197 = vector.shape_cast %196 : vector<1x2x128xf32> to vector<2x128xf32>
    %cst_64 = arith.constant dense<0.000000e+00> : vector<2x128xf32>
    %198 = tpu.matmul %190, %3, %cst_64 {dimension_numbers = #tpu.dot_dimension_numbers<[1], [0], [0], [1], [0, 0, 1, 1], [], []>} : vector<2x32xf32>, vector<32x128xf32>, vector<2x128xf32> -> vector<2x128xf32>
    %199 = arith.addf %197, %198 : vector<2x128xf32>
    %200 = arith.negf %199 : vector<2x128xf32>
    %201 = math.exp %200 : vector<2x128xf32>
    %cst_65 = arith.constant 1.000000e+00 : f32
    %202 = vector.broadcast %cst_65 : f32 to vector<2x128xf32>
    %203 = arith.addf %202, %201 : vector<2x128xf32>
    %204 = arith.divf %202, %203 : vector<2x128xf32>
    %205 = vector.extract_strided_slice %204 {offsets = [0, 0], sizes = [2, 32], strides = [1, 1]} : vector<2x128xf32> to vector<2x32xf32>
    %206 = vector.extract_strided_slice %204 {offsets = [0, 32], sizes = [2, 32], strides = [1, 1]} : vector<2x128xf32> to vector<2x32xf32>
    %207 = vector.extract_strided_slice %204 {offsets = [0, 64], sizes = [2, 32], strides = [1, 1]} : vector<2x128xf32> to vector<2x32xf32>
    %cst_66 = arith.constant 2.000000e+00 : f32
    %208 = vector.broadcast %cst_66 : f32 to vector<2x32xf32>
    %209 = arith.mulf %208, %207 : vector<2x32xf32>
    %cst_67 = arith.constant 1.000000e+00 : f32
    %210 = vector.broadcast %cst_67 : f32 to vector<2x32xf32>
    %211 = arith.subf %209, %210 : vector<2x32xf32>
    %212 = vector.extract_strided_slice %204 {offsets = [0, 96], sizes = [2, 32], strides = [1, 1]} : vector<2x128xf32> to vector<2x32xf32>
    %213 = arith.mulf %206, %188 : vector<2x32xf32>
    %214 = arith.mulf %205, %211 : vector<2x32xf32>
    %215 = arith.addf %213, %214 : vector<2x32xf32>
    %216 = math.tanh %215 : vector<2x32xf32>
    %217 = arith.mulf %212, %216 : vector<2x32xf32>
    %218 = arith.index_cast %c7_i32 : i32 to index
    %c0_68 = arith.constant 0 : index
    %c0_69 = arith.constant 0 : index
    %219 = vector.load %arg3[%218, %c0_68, %c0_69] : memref<8x2x32xf32, #tpu.memory_space<vmem>>, vector<1x2x32xf32>
    %220 = vector.shape_cast %219 : vector<1x2x32xf32> to vector<2x32xf32>
    %221 = vector.shape_cast %217 : vector<2x32xf32> to vector<1x2x32xf32>
    tpu.vector_store %arg3[%218, %c0_68, %c0_69], %221 {strides = array<i32>} : memref<8x2x32xf32, #tpu.memory_space<vmem>>, vector<1x2x32xf32>,
    %c8_i32 = arith.constant 8 : i32
    %c0_70 = arith.constant 0 : index
    %c0_71 = arith.constant 0 : index
    %222 = vector.load %arg4[%c0_70, %c0_71] : memref<2x32xf32, #tpu.memory_space<vmem>>, vector<2x32xf32>
    tpu.vector_store %arg4[%c0_70, %c0_71], %217 {strides = array<i32>} : memref<2x32xf32, #tpu.memory_space<vmem>>, vector<2x32xf32>,
    %c0_72 = arith.constant 0 : index
    %c0_73 = arith.constant 0 : index
    %223 = vector.load %arg5[%c0_72, %c0_73] : memref<2x32xf32, #tpu.memory_space<vmem>>, vector<2x32xf32>
    tpu.vector_store %arg5[%c0_72, %c0_73], %215 {strides = array<i32>} : memref<2x32xf32, #tpu.memory_space<vmem>>, vector<2x32xf32>,
    return
  }
  func.func @transform_0(%arg0: i32) -> (i32, i32, i32) {
    %c0_i32 = arith.constant 0 : i32
    %c0_i32_0 = arith.constant 0 : i32
    %c0_i32_1 = arith.constant 0 : i32
    return %arg0, %c0_i32, %c0_i32_0 : i32, i32, i32
  }
  func.func @transform_1(%arg0: i32) -> (i32, i32) {
    %c0_i32 = arith.constant 0 : i32
    %c0_i32_0 = arith.constant 0 : i32
    %c0_i32_1 = arith.constant 0 : i32
    return %c0_i32, %c0_i32_0 : i32, i32
  }
  func.func @transform_2(%arg0: i32) -> (i32, i32, i32) {
    %c0_i32 = arith.constant 0 : i32
    %c0_i32_0 = arith.constant 0 : i32
    %c0_i32_1 = arith.constant 0 : i32
    return %arg0, %c0_i32, %c0_i32_0 : i32, i32, i32
  }
  func.func @transform_3(%arg0: i32) -> (i32, i32) {
    %c0_i32 = arith.constant 0 : i32
    %c0_i32_0 = arith.constant 0 : i32
    %c0_i32_1 = arith.constant 0 : i32
    return %c0_i32, %c0_i32_0 : i32, i32
  }
  func.func @transform_4(%arg0: i32) -> (i32, i32) {
    %c0_i32 = arith.constant 0 : i32
    %c0_i32_0 = arith.constant 0 : i32
    %c0_i32_1 = arith.constant 0 : i32
    return %c0_i32, %c0_i32_0 : i32, i32
  }
}

</mosaic_0001>

<bundles_post_ra>
// kernel: tpu_custom_call.1
= control target key start
LH: loop header
LB: loop body
LE: loop exit
PB: predicated region body
PF: predicated region fallthrough
CT: control target
= control target key end

     0   :  { %10 = vsyncpa [#allocation3], 0  ;;  %s998_s0 = inlined_call_operand.hbm [shape: f32[8,2,128], index: 0, kind: input, shape index: {}]   ;;  %s999_s1 = inlined_call_operand.hbm [shape: f32[32,128], index: 1, kind: input, shape index: {}]   ;;  %s1000_s2 = inlined_call_operand.hbm [shape: f32[8,2,32], index: 2, kind: output, shape index: {0}]   ;;  %s1001_s3 = inlined_call_operand.hbm [shape: f32[2,32], index: 3, kind: output, shape index: {1}]   ;;  %s1002_s4 = inlined_call_operand.hbm [shape: f32[2,32], index: 4, kind: output, shape index: {2}]  }
   0x1   :  { %11 = vsyncpa [#allocation6], 0 }
   0x2   :  { %12 = vsyncpa [#allocation4], 0 }
   0x3   :  { %13 = vsyncpa [#allocation9], 0  ;;  %s18_s17 = sshll.u32 %s998_s0, 4  ;;  %s887_s18 = smov [#allocation2]   ;;  %s19_s17 = int_to_ptr.hbm [resolvable:$true] %s18_s17 }
   0x4   :  { %s20_s19 = sshll.u32 %s887_s18, 4  ;;  %s31_s22 = sshll.u32 %s999_s1, 4  ;;  %s21_s19 = int_to_ptr.vmem [resolvable:$true] %s20_s19  ;;  %s32_s22 = int_to_ptr.hbm [resolvable:$true] %s31_s22 }
   0x5   :  { %s888_s23 = smov 32   ;;  %s889_s24 = smov 2  }
   0x6   :  { %26 = dma.hbm_to_vmem [thread:$0]  %s19_s17, 256, %s21_s19, [#allocation3], %s888_s23, %s888_s23, %s889_s24  }
   0x7   :  { %s890_s25 = smov [#allocation5]   ;;  %s891_s27 = smov 128  }
   0x8   :  { %s33_s26 = sshll.u32 %s890_s25, 4  ;;  %s892_s0 = smov 8   ;;  %s34_s26 = int_to_ptr.vmem [resolvable:$true] %s33_s26 }
   0x9   :  { %39 = dma.hbm_to_vmem [thread:$0]  %s32_s22, 512, %s34_s26, [#allocation6], %s891_s27, %s891_s27, %s892_s0  }
   0xa   :  { %879 = dma.done.wait [#allocation3], 256  }
   0xb   :  { %880 = vsyncadd [#allocation3], 4294967040 }
   0xc   :  { %881 = dma.done.wait [#allocation6], 512  }
   0xd   :  { %882 = vsyncadd [#allocation6], 4294966784  ;;  %vm52_vm0 = vcmask 254976   ;;  %v893_v0 = vmov 0.0   ;;  %v58_v1 = vld [vmem:[#allocation5 + $0x18] sm:$0xff]  ;;  %v57_v2 = vld [vmem:[#allocation5 + $0x10] sm:$0xff] }
   0xe   :  { %53 = vst.msk [vmem:[#allocation8] sm:$0x3] %vm52_vm0, %v893_v0  ;;  %78 = vmatpush.msra.mxu0 %v58_v1  ;;  %151 = vmatpush.msra.mxu1 %v58_v1  ;;  %v56_v3 = vld [vmem:[#allocation5 + $0x8] sm:$0xff]  ;;  %v55_v4 = vld [vmem:[#allocation5] sm:$0xff]  ;;  %vm62_vm1 = vcmask 261120   ;;  %s894_s1 = smov 64  }
   0xf   :  { %54 = vst.msk [vmem:[#allocation10] sm:$0x3] %vm52_vm0, %v893_v0  ;;  %220 = vmatpush.msra.mxu2 %v58_v1  ;;  %289 = vmatpush.msra.mxu3 %v58_v1  ;;  %v61_v6 = vld [vmem:[#allocation2] sm:$0x3]  ;;  %v136_v35 = vld [vmem:[#allocation2 + $0x2] sm:$0x3] }
  0x10   :  { %79 = vmatpush.msra.mxu0 %v57_v2  ;;  %152 = vmatpush.msra.mxu1 %v57_v2  ;;  %v205_v62 = vld [vmem:[#allocation2 + $0x4] sm:$0x3]  ;;  %s895_s28 = smov 96   ;;  %s896_s29 = smov [#allocation7]  }
  0x11   :  { %221 = vmatpush.msra.mxu2 %v57_v2  ;;  %290 = vmatpush.msra.mxu3 %v57_v2  ;;  %s628_s30 = sshll.u32 %s896_s29, 4  ;;  %s630_s7 = sshll.u32 %s1000_s2, 4  ;;  %s629_s30 = int_to_ptr.vmem [resolvable:$true] %s628_s30  ;;  %s631_s7 = int_to_ptr.hbm [resolvable:$true] %s630_s7 }
  0x12   :  { %80 = vmatpush.msra.mxu0 %v56_v3  ;;  %153 = vmatpush.msra.mxu1 %v56_v3  ;;  %s897_s8 = smov [#allocation8]   ;;  %s644_s12 = sshll.u32 %s1001_s3, 4  ;;  %s645_s12 = int_to_ptr.hbm [resolvable:$true] %s644_s12 }
  0x13   :  { %222 = vmatpush.msra.mxu2 %v56_v3  ;;  %291 = vmatpush.msra.mxu3 %v56_v3  ;;  %s642_s9 = sshll.u32 %s897_s8, 4  ;;  %s898_s13 = smov [#allocation10]   ;;  %s643_s9 = int_to_ptr.vmem [resolvable:$true] %s642_s9 }
  0x14   :  { %81 = vmatpush.msra.mxu0 %v55_v4  ;;  %154 = vmatpush.msra.mxu1 %v55_v4  ;;  %s653_s14 = sshll.u32 %s898_s13, 4  ;;  %s655_s17 = sshll.u32 %s1002_s4, 4  ;;  %s654_s14 = int_to_ptr.vmem [resolvable:$true] %s653_s14  ;;  %s656_s17 = int_to_ptr.hbm [resolvable:$true] %s655_s17 }
  0x15   :  { %v59_v5 = vld [vmem:[#allocation8] sm:$0x3]  ;;  %223 = vmatpush.msra.mxu2 %v55_v4  ;;  %292 = vmatpush.msra.mxu3 %v55_v4 }
  0x16   :  { %675 = vmatmul.msk.f32.vlgmr.msra.gmra.mxu0 %vm62_vm1, %v59_v5  ;;  %427 = vmatpush.msrb.mxu1 %v58_v1  ;;  %v60_v24 = vld [vmem:[#allocation10] sm:$0x3] }
  0x17   :  { %358 = vmatpush.msrb.mxu0 %v58_v1  ;;  %496 = vmatpush.msrb.mxu2 %v58_v1 }
  0x18   :  { %565 = vmatpush.msrb.mxu3 %v58_v1  ;;  %428 = vmatpush.msrb.mxu1 %v57_v2 }
  0x19   :  { %359 = vmatpush.msrb.mxu0 %v57_v2  ;;  %497 = vmatpush.msrb.mxu2 %v57_v2 }
  0x1a   :  { %566 = vmatpush.msrb.mxu3 %v57_v2  ;;  %429 = vmatpush.msrb.mxu1 %v56_v3 }
  0x1b   :  { %360 = vmatpush.msrb.mxu0 %v56_v3  ;;  %498 = vmatpush.msrb.mxu2 %v56_v3 }
  0x1c   :  { %567 = vmatpush.msrb.mxu3 %v56_v3  ;;  %430 = vmatpush.msrb.mxu1 %v55_v4 }
  0x1d   :  { %361 = vmatpush.msrb.mxu0 %v55_v4  ;;  %499 = vmatpush.msrb.mxu2 %v55_v4 }
  0x1e   :  { %568 = vmatpush.msrb.mxu3 %v55_v4 }
  0x93   :  { %v83_v7 = vpop.f32.mrf.mxu0 }
  0x94   :  { %v86_v8 = vadd.f32 %v83_v7, %v61_v6 }
  0x96   :  { %v676_v9 = vmul.f32 -1.442695, %v86_v8 }
  0x98   :  { %711 = vpow2.f32 %v676_v9 }
  0x9e   :  { %v712_v10 = vpop.eup %711 }
  0x9f   :  { %v90_v11 = vadd.f32 1.0, %v712_v10 }
  0xa1   :  { %713 = vrcp.f32 %v90_v11  ;;  %v102_v15 = vand.u32 2147483648, %v90_v11  ;;  %v100_v17 = vand.u32 2147483647, %v90_v11  ;;  %vm96_vm3 = vweird.f32 %v90_v11 }
  0xa3   :  { %v103_v19 = vor.u32 1.1754944e-38, %v102_v15  ;;  %vm101_vm5 = vcmp.eq.f32.partialorder %v100_v17, 8.507059e+37 }
  0xa7   :  { %v714_v12 = vpop.eup %713 }
  0xa8   :  { %v92_v13 = vmul.f32 %v714_v12, %v90_v11  ;;  %vm97_vm2 = vweird.f32 %v714_v12 }
  0xa9   :  { %vm98_vm4 = vmor %vm96_vm3, %vm97_vm2 }
  0xaa   :  { %v93_v14 = vsub.f32 1.0, %v92_v13 }
  0xac   :  { %v94_v16 = vmul.f32 %v714_v12, %v93_v14 }
  0xae   :  { %v95_v18 = vadd.f32 %v714_v12, %v94_v16 }
  0xb0   :  { %v99_v20 = vsel %vm98_vm4, %v714_v12, %v95_v18 }
  0xb1   :  { %v104_v21 = vsel %vm101_vm5, %v103_v19, %v99_v20 }
  0xb2   :  { %v106_v22 = vmul.f32 2.0, %v104_v21 }
  0xb4   :  { %v677_v23 = vadd.f32 -1.0, %v106_v22 }
  0xb6   :  { %114 = vrot.lane.b32.xlu0 %v677_v23, %s894_s1 }
  0xbe   :  { %109 = vrot.lane.b32.xlu0 %v60_v24, %s888_s23 }
 0x128   :  { %v115_v25 = vpop.permute.xlu0 %114 }
 0x129   :  { %v117_v26 = vmul.f32 %v115_v25, %v104_v21  ;;  %v274_v25 = vld [vmem:[#allocation2 + $0x6] sm:$0x3] }
 0x12b   :  { %119 = vrot.lane.b32.xlu1 %v117_v26, %s888_s23 }
 0x130   :  { %v110_v27 = vpop.permute.xlu0 %109 }
 0x131   :  { %v112_v28 = vmul.f32 %v110_v27, %v104_v21 }
 0x19d   :  { %v120_v29 = vpop.permute.xlu1 %119 }
 0x19e   :  { %v122_v30 = vadd.f32 %v120_v29, %v112_v28 }
 0x1a0   :  { %715 = vtanh.f32 %v122_v30 }
 0x1a6   :  { %v716_v31 = vpop.eup %715 }
 0x1a7   :  { %125 = vrot.lane.b32.xlu1 %v716_v31, %s894_s1 }
 0x219   :  { %v126_v32 = vpop.permute.xlu1 %125 }
 0x21a   :  { %v128_v33 = vmul.f32 %v126_v32, %v104_v21 }
 0x21c   :  { %130 = vrot.lane.b32.xlu2 %v128_v33, %s888_s23 }
 0x276   :  { %v131_v34 = vpop.permute.xlu2 %130 }
 0x277   :  { %134 = vst.msk [vmem:[#allocation7] sm:$0x3] %vm52_vm0, %v131_v34  ;;  %678 = vmatmul.msk.f32.vlgmr.msra.gmra.mxu1 %vm62_vm1, %v131_v34 }
 0x2f4   :  { %v156_v36 = vpop.f32.mrf.mxu1 }
 0x2f5   :  { %v159_v37 = vadd.f32 %v156_v36, %v136_v35 }
 0x2f7   :  { %v679_v38 = vmul.f32 -1.442695, %v159_v37 }
 0x2f9   :  { %717 = vpow2.f32 %v679_v38 }
 0x2ff   :  { %v718_v39 = vpop.eup %717 }
 0x300   :  { %v163_v40 = vadd.f32 1.0, %v718_v39 }
 0x302   :  { %719 = vrcp.f32 %v163_v40  ;;  %v175_v44 = vand.u32 2147483648, %v163_v40  ;;  %v173_v46 = vand.u32 2147483647, %v163_v40  ;;  %vm169_vm7 = vweird.f32 %v163_v40 }
 0x304   :  { %v176_v48 = vor.u32 1.1754944e-38, %v175_v44  ;;  %vm174_vm9 = vcmp.eq.f32.partialorder %v173_v46, 8.507059e+37 }
 0x308   :  { %v720_v41 = vpop.eup %719 }
 0x309   :  { %v165_v42 = vmul.f32 %v720_v41, %v163_v40  ;;  %vm170_vm6 = vweird.f32 %v720_v41 }
 0x30a   :  { %vm171_vm8 = vmor %vm169_vm7, %vm170_vm6 }
 0x30b   :  { %v166_v43 = vsub.f32 1.0, %v165_v42 }
 0x30d   :  { %v167_v45 = vmul.f32 %v720_v41, %v166_v43 }
 0x30f   :  { %v168_v47 = vadd.f32 %v720_v41, %v167_v45 }
 0x311   :  { %v172_v49 = vsel %vm171_vm8, %v720_v41, %v168_v47 }
 0x312   :  { %v177_v50 = vsel %vm174_vm9, %v176_v48, %v172_v49 }
 0x313   :  { %v179_v51 = vmul.f32 2.0, %v177_v50  ;;  %v181_v55 = vmul.f32 %v177_v50, %v122_v30 }
 0x315   :  { %v680_v52 = vadd.f32 -1.0, %v179_v51 }
 0x317   :  { %183 = vrot.lane.b32.xlu2 %v680_v52, %s894_s1  ;;  %v343_v52 = vld [vmem:[#allocation2 + $0x8] sm:$0x3] }
 0x371   :  { %v184_v53 = vpop.permute.xlu2 %183 }
 0x372   :  { %v186_v54 = vmul.f32 %v184_v53, %v177_v50 }
 0x374   :  { %188 = vrot.lane.b32.xlu0 %v186_v54, %s888_s23 }
 0x3e6   :  { %v189_v56 = vpop.permute.xlu0 %188 }
 0x3e7   :  { %v191_v57 = vadd.f32 %v189_v56, %v181_v55 }
 0x3e9   :  { %721 = vtanh.f32 %v191_v57 }
 0x3ef   :  { %v722_v58 = vpop.eup %721 }
 0x3f0   :  { %194 = vrot.lane.b32.xlu1 %v722_v58, %s894_s1 }
 0x462   :  { %v195_v59 = vpop.permute.xlu1 %194 }
 0x463   :  { %v197_v60 = vmul.f32 %v195_v59, %v177_v50 }
 0x465   :  { %199 = vrot.lane.b32.xlu2 %v197_v60, %s888_s23 }
 0x4bf   :  { %v200_v61 = vpop.permute.xlu2 %199 }
 0x4c0   :  { %203 = vst.msk [vmem:[#allocation7 + $0x2] sm:$0x3] %vm52_vm0, %v200_v61  ;;  %681 = vmatmul.msk.f32.vlgmr.msra.gmra.mxu2 %vm62_vm1, %v200_v61 }
 0x543   :  { %v225_v63 = vpop.f32.mrf.mxu2 }
 0x544   :  { %v228_v0 = vadd.f32 %v225_v63, %v205_v62 }
 0x546   :  { %v682_v1 = vmul.f32 -1.442695, %v228_v0 }
 0x548   :  { %723 = vpow2.f32 %v682_v1 }
 0x54e   :  { %v724_v2 = vpop.eup %723 }
 0x54f   :  { %v232_v3 = vadd.f32 1.0, %v724_v2 }
 0x551   :  { %725 = vrcp.f32 %v232_v3  ;;  %v244_v7 = vand.u32 2147483648, %v232_v3  ;;  %v242_v9 = vand.u32 2147483647, %v232_v3  ;;  %vm238_vm11 = vweird.f32 %v232_v3 }
 0x553   :  { %v245_v11 = vor.u32 1.1754944e-38, %v244_v7  ;;  %vm243_vm13 = vcmp.eq.f32.partialorder %v242_v9, 8.507059e+37 }
 0x557   :  { %v726_v4 = vpop.eup %725 }
 0x558   :  { %v234_v5 = vmul.f32 %v726_v4, %v232_v3  ;;  %vm239_vm10 = vweird.f32 %v726_v4 }
 0x559   :  { %vm240_vm12 = vmor %vm238_vm11, %vm239_vm10 }
 0x55a   :  { %v235_v6 = vsub.f32 1.0, %v234_v5 }
 0x55c   :  { %v236_v8 = vmul.f32 %v726_v4, %v235_v6 }
 0x55e   :  { %v237_v10 = vadd.f32 %v726_v4, %v236_v8 }
 0x560   :  { %v241_v12 = vsel %vm240_vm12, %v726_v4, %v237_v10 }
 0x561   :  { %v246_v13 = vsel %vm243_vm13, %v245_v11, %v241_v12 }
 0x562   :  { %v248_v14 = vmul.f32 2.0, %v246_v13  ;;  %v250_v18 = vmul.f32 %v246_v13, %v191_v57 }
 0x564   :  { %v683_v15 = vadd.f32 -1.0, %v248_v14 }
 0x566   :  { %252 = vrot.lane.b32.xlu0 %v683_v15, %s894_s1  ;;  %v412_v15 = vld [vmem:[#allocation2 + $0xa] sm:$0x3] }
 0x5d8   :  { %v253_v16 = vpop.permute.xlu0 %252 }
 0x5d9   :  { %v255_v17 = vmul.f32 %v253_v16, %v246_v13 }
 0x5db   :  { %257 = vrot.lane.b32.xlu1 %v255_v17, %s888_s23 }
 0x64d   :  { %v258_v19 = vpop.permute.xlu1 %257 }
 0x64e   :  { %v260_v20 = vadd.f32 %v258_v19, %v250_v18 }
 0x650   :  { %727 = vtanh.f32 %v260_v20 }
 0x656   :  { %v728_v21 = vpop.eup %727 }
 0x657   :  { %263 = vrot.lane.b32.xlu2 %v728_v21, %s894_s1 }
 0x6b1   :  { %v264_v22 = vpop.permute.xlu2 %263 }
 0x6b2   :  { %v266_v23 = vmul.f32 %v264_v22, %v246_v13 }
 0x6b4   :  { %268 = vrot.lane.b32.xlu0 %v266_v23, %s888_s23 }
 0x726   :  { %v269_v24 = vpop.permute.xlu0 %268 }
 0x727   :  { %272 = vst.msk [vmem:[#allocation7 + $0x4] sm:$0x3] %vm52_vm0, %v269_v24  ;;  %684 = vmatmul.msk.f32.vlgmr.msra.gmra.mxu3 %vm62_vm1, %v269_v24 }
 0x7aa   :  { %v294_v26 = vpop.f32.mrf.mxu3 }
 0x7ab   :  { %v297_v27 = vadd.f32 %v294_v26, %v274_v25 }
 0x7ad   :  { %v685_v28 = vmul.f32 -1.442695, %v297_v27 }
 0x7af   :  { %729 = vpow2.f32 %v685_v28 }
 0x7b5   :  { %v730_v29 = vpop.eup %729 }
 0x7b6   :  { %v301_v30 = vadd.f32 1.0, %v730_v29 }
 0x7b8   :  { %731 = vrcp.f32 %v301_v30  ;;  %v313_v34 = vand.u32 2147483648, %v301_v30  ;;  %v311_v36 = vand.u32 2147483647, %v301_v30  ;;  %vm307_vm15 = vweird.f32 %v301_v30 }
 0x7ba   :  { %v314_v38 = vor.u32 1.1754944e-38, %v313_v34  ;;  %vm312_vm3 = vcmp.eq.f32.partialorder %v311_v36, 8.507059e+37 }
 0x7be   :  { %v732_v31 = vpop.eup %731 }
 0x7bf   :  { %v303_v32 = vmul.f32 %v732_v31, %v301_v30  ;;  %vm308_vm14 = vweird.f32 %v732_v31 }
 0x7c0   :  { %vm309_vm2 = vmor %vm307_vm15, %vm308_vm14 }
 0x7c1   :  { %v304_v33 = vsub.f32 1.0, %v303_v32 }
 0x7c3   :  { %v305_v35 = vmul.f32 %v732_v31, %v304_v33 }
 0x7c5   :  { %v306_v37 = vadd.f32 %v732_v31, %v305_v35 }
 0x7c7   :  { %v310_v39 = vsel %vm309_vm2, %v732_v31, %v306_v37 }
 0x7c8   :  { %v315_v40 = vsel %vm312_vm3, %v314_v38, %v310_v39 }
 0x7c9   :  { %v317_v41 = vmul.f32 2.0, %v315_v40  ;;  %v319_v45 = vmul.f32 %v315_v40, %v260_v20 }
 0x7cb   :  { %v686_v42 = vadd.f32 -1.0, %v317_v41 }
 0x7cd   :  { %321 = vrot.lane.b32.xlu1 %v686_v42, %s894_s1  ;;  %v481_v42 = vld [vmem:[#allocation2 + $0xc] sm:$0x3] }
 0x83f   :  { %v322_v43 = vpop.permute.xlu1 %321 }
 0x840   :  { %v324_v44 = vmul.f32 %v322_v43, %v315_v40 }
 0x842   :  { %326 = vrot.lane.b32.xlu2 %v324_v44, %s888_s23 }
 0x89c   :  { %v327_v46 = vpop.permute.xlu2 %326 }
 0x89d   :  { %v329_v47 = vadd.f32 %v327_v46, %v319_v45 }
 0x89f   :  { %733 = vtanh.f32 %v329_v47 }
 0x8a5   :  { %v734_v48 = vpop.eup %733 }
 0x8a6   :  { %332 = vrot.lane.b32.xlu0 %v734_v48, %s894_s1 }
 0x918   :  { %v333_v49 = vpop.permute.xlu0 %332 }
 0x919   :  { %v335_v50 = vmul.f32 %v333_v49, %v315_v40 }
 0x91b   :  { %337 = vrot.lane.b32.xlu1 %v335_v50, %s888_s23 }
 0x98d   :  { %v338_v51 = vpop.permute.xlu1 %337 }
 0x98e   :  { %341 = vst.msk [vmem:[#allocation7 + $0x6] sm:$0x3] %vm52_vm0, %v338_v51  ;;  %687 = vmatmul.msk.f32.vlgmr.msrb.gmra.mxu0 %vm62_vm1, %v338_v51 }
 0xa0b   :  { %v363_v53 = vpop.f32.mrf.mxu0 }
 0xa0c   :  { %v366_v54 = vadd.f32 %v363_v53, %v343_v52 }
 0xa0e   :  { %v688_v55 = vmul.f32 -1.442695, %v366_v54 }
 0xa10   :  { %735 = vpow2.f32 %v688_v55 }
 0xa16   :  { %v736_v56 = vpop.eup %735 }
 0xa17   :  { %v370_v57 = vadd.f32 1.0, %v736_v56 }
 0xa19   :  { %737 = vrcp.f32 %v370_v57  ;;  %v382_v61 = vand.u32 2147483648, %v370_v57  ;;  %v380_v63 = vand.u32 2147483647, %v370_v57  ;;  %vm376_vm5 = vweird.f32 %v370_v57 }
 0xa1b   :  { %v383_v1 = vor.u32 1.1754944e-38, %v382_v61  ;;  %vm381_vm7 = vcmp.eq.f32.partialorder %v380_v63, 8.507059e+37 }
 0xa1f   :  { %v738_v58 = vpop.eup %737 }
 0xa20   :  { %v372_v59 = vmul.f32 %v738_v58, %v370_v57  ;;  %vm377_vm4 = vweird.f32 %v738_v58 }
 0xa21   :  { %vm378_vm6 = vmor %vm376_vm5, %vm377_vm4 }
 0xa22   :  { %v373_v60 = vsub.f32 1.0, %v372_v59 }
 0xa24   :  { %v374_v62 = vmul.f32 %v738_v58, %v373_v60 }
 0xa26   :  { %v375_v0 = vadd.f32 %v738_v58, %v374_v62 }
 0xa28   :  { %v379_v2 = vsel %vm378_vm6, %v738_v58, %v375_v0 }
 0xa29   :  { %v384_v3 = vsel %vm381_vm7, %v383_v1, %v379_v2 }
 0xa2a   :  { %v386_v4 = vmul.f32 2.0, %v384_v3  ;;  %v388_v8 = vmul.f32 %v384_v3, %v329_v47 }
 0xa2c   :  { %v689_v5 = vadd.f32 -1.0, %v386_v4 }
 0xa2e   :  { %390 = vrot.lane.b32.xlu2 %v689_v5, %s894_s1  ;;  %v550_v5 = vld [vmem:[#allocation2 + $0xe] sm:$0x3] }
 0xa88   :  { %v391_v6 = vpop.permute.xlu2 %390 }
 0xa89   :  { %v393_v7 = vmul.f32 %v391_v6, %v384_v3 }
 0xa8b   :  { %395 = vrot.lane.b32.xlu0 %v393_v7, %s888_s23 }
 0xafd   :  { %v396_v9 = vpop.permute.xlu0 %395 }
 0xafe   :  { %v398_v10 = vadd.f32 %v396_v9, %v388_v8 }
 0xb00   :  { %739 = vtanh.f32 %v398_v10 }
 0xb06   :  { %v740_v11 = vpop.eup %739 }
 0xb07   :  { %401 = vrot.lane.b32.xlu1 %v740_v11, %s894_s1 }
 0xb79   :  { %v402_v12 = vpop.permute.xlu1 %401 }
 0xb7a   :  { %v404_v13 = vmul.f32 %v402_v12, %v384_v3 }
 0xb7c   :  { %406 = vrot.lane.b32.xlu2 %v404_v13, %s888_s23 }
 0xbd6   :  { %v407_v14 = vpop.permute.xlu2 %406 }
 0xbd7   :  { %410 = vst.msk [vmem:[#allocation7 + $0x8] sm:$0x3] %vm52_vm0, %v407_v14  ;;  %690 = vmatmul.msk.f32.vlgmr.msrb.gmra.mxu1 %vm62_vm1, %v407_v14 }
 0xc54   :  { %v432_v16 = vpop.f32.mrf.mxu1 }
 0xc55   :  { %v435_v17 = vadd.f32 %v432_v16, %v412_v15 }
 0xc57   :  { %v691_v18 = vmul.f32 -1.442695, %v435_v17 }
 0xc59   :  { %741 = vpow2.f32 %v691_v18 }
 0xc5f   :  { %v742_v19 = vpop.eup %741 }
 0xc60   :  { %v439_v20 = vadd.f32 1.0, %v742_v19 }
 0xc62   :  { %743 = vrcp.f32 %v439_v20  ;;  %v451_v24 = vand.u32 2147483648, %v439_v20  ;;  %v449_v26 = vand.u32 2147483647, %v439_v20  ;;  %vm445_vm9 = vweird.f32 %v439_v20 }
 0xc64   :  { %v452_v28 = vor.u32 1.1754944e-38, %v451_v24  ;;  %vm450_vm11 = vcmp.eq.f32.partialorder %v449_v26, 8.507059e+37 }
 0xc68   :  { %v744_v21 = vpop.eup %743 }
 0xc69   :  { %v441_v22 = vmul.f32 %v744_v21, %v439_v20  ;;  %vm446_vm8 = vweird.f32 %v744_v21 }
 0xc6a   :  { %vm447_vm10 = vmor %vm445_vm9, %vm446_vm8 }
 0xc6b   :  { %v442_v23 = vsub.f32 1.0, %v441_v22 }
 0xc6d   :  { %v443_v25 = vmul.f32 %v744_v21, %v442_v23 }
 0xc6f   :  { %v444_v27 = vadd.f32 %v744_v21, %v443_v25 }
 0xc71   :  { %v448_v29 = vsel %vm447_vm10, %v744_v21, %v444_v27 }
 0xc72   :  { %v453_v30 = vsel %vm450_vm11, %v452_v28, %v448_v29 }
 0xc73   :  { %v455_v31 = vmul.f32 2.0, %v453_v30  ;;  %v457_v35 = vmul.f32 %v453_v30, %v398_v10 }
 0xc75   :  { %v692_v32 = vadd.f32 -1.0, %v455_v31 }
 0xc77   :  { %459 = vrot.lane.b32.xlu0 %v692_v32, %s894_s1 }
 0xce9   :  { %v460_v33 = vpop.permute.xlu0 %459 }
 0xcea   :  { %v462_v34 = vmul.f32 %v460_v33, %v453_v30 }
 0xcec   :  { %464 = vrot.lane.b32.xlu1 %v462_v34, %s888_s23 }
 0xd5e   :  { %v465_v36 = vpop.permute.xlu1 %464 }
 0xd5f   :  { %v467_v37 = vadd.f32 %v465_v36, %v457_v35 }
 0xd61   :  { %745 = vtanh.f32 %v467_v37 }
 0xd67   :  { %v746_v38 = vpop.eup %745 }
 0xd68   :  { %470 = vrot.lane.b32.xlu2 %v746_v38, %s894_s1 }
 0xdc2   :  { %v471_v39 = vpop.permute.xlu2 %470 }
 0xdc3   :  { %v473_v40 = vmul.f32 %v471_v39, %v453_v30 }
 0xdc5   :  { %475 = vrot.lane.b32.xlu0 %v473_v40, %s888_s23 }
 0xe37   :  { %v476_v41 = vpop.permute.xlu0 %475 }
 0xe38   :  { %479 = vst.msk [vmem:[#allocation7 + $0xa] sm:$0x3] %vm52_vm0, %v476_v41  ;;  %693 = vmatmul.msk.f32.vlgmr.msrb.gmra.mxu2 %vm62_vm1, %v476_v41 }
 0xebb   :  { %v501_v43 = vpop.f32.mrf.mxu2 }
 0xebc   :  { %v504_v44 = vadd.f32 %v501_v43, %v481_v42 }
 0xebe   :  { %v694_v45 = vmul.f32 -1.442695, %v504_v44 }
 0xec0   :  { %747 = vpow2.f32 %v694_v45 }
 0xec6   :  { %v748_v46 = vpop.eup %747 }
 0xec7   :  { %v508_v47 = vadd.f32 1.0, %v748_v46 }
 0xec9   :  { %749 = vrcp.f32 %v508_v47  ;;  %v520_v51 = vand.u32 2147483648, %v508_v47  ;;  %v518_v53 = vand.u32 2147483647, %v508_v47  ;;  %vm514_vm13 = vweird.f32 %v508_v47 }
 0xecb   :  { %v521_v55 = vor.u32 1.1754944e-38, %v520_v51  ;;  %vm519_vm15 = vcmp.eq.f32.partialorder %v518_v53, 8.507059e+37 }
 0xecf   :  { %v750_v48 = vpop.eup %749 }
 0xed0   :  { %v510_v49 = vmul.f32 %v750_v48, %v508_v47  ;;  %vm515_vm12 = vweird.f32 %v750_v48 }
 0xed1   :  { %vm516_vm14 = vmor %vm514_vm13, %vm515_vm12 }
 0xed2   :  { %v511_v50 = vsub.f32 1.0, %v510_v49 }
 0xed4   :  { %v512_v52 = vmul.f32 %v750_v48, %v511_v50 }
 0xed6   :  { %v513_v54 = vadd.f32 %v750_v48, %v512_v52 }
 0xed8   :  { %v517_v56 = vsel %vm516_vm14, %v750_v48, %v513_v54 }
 0xed9   :  { %v522_v57 = vsel %vm519_vm15, %v521_v55, %v517_v56 }
 0xeda   :  { %v524_v58 = vmul.f32 2.0, %v522_v57  ;;  %v526_v62 = vmul.f32 %v522_v57, %v467_v37 }
 0xedc   :  { %v695_v59 = vadd.f32 -1.0, %v524_v58 }
 0xede   :  { %528 = vrot.lane.b32.xlu1 %v695_v59, %s894_s1 }
 0xf50   :  { %v529_v60 = vpop.permute.xlu1 %528 }
 0xf51   :  { %v531_v61 = vmul.f32 %v529_v60, %v522_v57 }
 0xf53   :  { %533 = vrot.lane.b32.xlu2 %v531_v61, %s888_s23 }
 0xfad   :  { %v534_v63 = vpop.permute.xlu2 %533 }
 0xfae   :  { %v536_v0 = vadd.f32 %v534_v63, %v526_v62 }
 0xfb0   :  { %751 = vtanh.f32 %v536_v0 }
 0xfb6   :  { %v752_v1 = vpop.eup %751 }
 0xfb7   :  { %539 = vrot.lane.b32.xlu0 %v752_v1, %s894_s1 }
0x1029   :  { %v540_v2 = vpop.permute.xlu0 %539 }
0x102a   :  { %v542_v3 = vmul.f32 %v540_v2, %v522_v57 }
0x102c   :  { %544 = vrot.lane.b32.xlu1 %v542_v3, %s888_s23 }
0x109e   :  { %v545_v4 = vpop.permute.xlu1 %544 }
0x109f   :  { %548 = vst.msk [vmem:[#allocation7 + $0xc] sm:$0x3] %vm52_vm0, %v545_v4  ;;  %696 = vmatmul.msk.f32.vlgmr.msrb.gmra.mxu3 %vm62_vm1, %v545_v4 }
0x1122   :  { %v570_v6 = vpop.f32.mrf.mxu3 }
0x1123   :  { %v573_v7 = vadd.f32 %v570_v6, %v550_v5 }
0x1125   :  { %v697_v8 = vmul.f32 -1.442695, %v573_v7 }
0x1127   :  { %753 = vpow2.f32 %v697_v8 }
0x112d   :  { %v754_v9 = vpop.eup %753 }
0x112e   :  { %v577_v10 = vadd.f32 1.0, %v754_v9 }
0x1130   :  { %755 = vrcp.f32 %v577_v10  ;;  %v589_v14 = vand.u32 2147483648, %v577_v10  ;;  %v587_v16 = vand.u32 2147483647, %v577_v10  ;;  %vm583_vm3 = vweird.f32 %v577_v10 }
0x1132   :  { %v590_v18 = vor.u32 1.1754944e-38, %v589_v14  ;;  %vm588_vm1 = vcmp.eq.f32.partialorder %v587_v16, 8.507059e+37 }
0x1136   :  { %v756_v11 = vpop.eup %755 }
0x1137   :  { %v579_v12 = vmul.f32 %v756_v11, %v577_v10  ;;  %vm584_vm2 = vweird.f32 %v756_v11 }
0x1138   :  { %vm585_vm4 = vmor %vm583_vm3, %vm584_vm2 }
0x1139   :  { %v580_v13 = vsub.f32 1.0, %v579_v12 }
0x113b   :  { %v581_v15 = vmul.f32 %v756_v11, %v580_v13 }
0x113d   :  { %v582_v17 = vadd.f32 %v756_v11, %v581_v15 }
0x113f   :  { %v586_v19 = vsel %vm585_vm4, %v756_v11, %v582_v17 }
0x1140   :  { %v591_v20 = vsel %vm588_vm1, %v590_v18, %v586_v19 }
0x1141   :  { %v593_v21 = vmul.f32 2.0, %v591_v20  ;;  %v595_v25 = vmul.f32 %v591_v20, %v536_v0 }
0x1143   :  { %v698_v22 = vadd.f32 -1.0, %v593_v21 }
0x1145   :  { %597 = vrot.lane.b32.xlu2 %v698_v22, %s894_s1 }
0x119f   :  { %v598_v23 = vpop.permute.xlu2 %597 }
0x11a0   :  { %v600_v24 = vmul.f32 %v598_v23, %v591_v20 }
0x11a2   :  { %602 = vrot.lane.b32.xlu0 %v600_v24, %s888_s23 }
0x1214   :  { %v603_v26 = vpop.permute.xlu0 %602 }
0x1215   :  { %v605_v27 = vadd.f32 %v603_v26, %v595_v25 }
0x1217   :  { %757 = vtanh.f32 %v605_v27  ;;  %620 = vrot.lane.b32.xlu0 %v605_v27, %s895_s28 }
0x121d   :  { %v758_v28 = vpop.eup %757 }
0x121e   :  { %608 = vrot.lane.b32.xlu1 %v758_v28, %s894_s1 }
0x1289   :  { %v621_v29 = vpop.permute.xlu0 %620 }
0x128a   :  { %623 = vst.msk [vmem:[#allocation10] sm:$0x3] %vm52_vm0, %v621_v29 }
0x1290   :  { %v609_v30 = vpop.permute.xlu1 %608 }
0x1291   :  { %v611_v31 = vmul.f32 %v609_v30, %v591_v20 }
0x1293   :  { %613 = vrot.lane.b32.xlu2 %v611_v31, %s888_s23 }
0x12ed   :  { %v614_v32 = vpop.permute.xlu2 %613 }
0x12ee   :  { %617 = vst.msk [vmem:[#allocation7 + $0xe] sm:$0x3] %vm52_vm0, %v614_v32 }
0x12ef   :  { %618 = vst.msk [vmem:[#allocation8] sm:$0x3] %vm52_vm0, %v614_v32  ;;  %636 = dma.vmem_to_hbm [thread:$0]  %s629_s30, 256, %s631_s7, [#allocation4], %s888_s23, %s888_s23, %s889_s24  }
0x12f0   :  { %647 = dma.vmem_to_hbm [thread:$0]  %s643_s9, 32, %s645_s12, [#allocation9]  }
0x12f1   :  { %658 = dma.vmem_to_hbm [thread:$0]  %s654_s14, 32, %s656_s17, [#allocation9]  }
0x12f2   :  { %883 = dma.done.wait [#allocation4], 256  }
0x12f3   :  { %884 = vsyncadd [#allocation4], 4294967040 }
0x12f4   :  { %885 = dma.done.wait [#allocation9], 64  }
0x12f5   :  { %886 = vsyncadd [#allocation9], 4294967232 }
0x12f6   :  { %671 = vsyncpa [#allocation3], 1 }
0x12f7   :  { %672 = vsyncpa [#allocation6], 1 }
0x12f8   :  { %673 = vsyncpa [#allocation4], 1 }
0x12f9   :  { %674 = vsyncpa [#allocation9], 1 }

</bundles_post_ra>
